<compile_context>
chip_gen: v5e
topology: v5e:2x2
jax: 0.10.0
libtpu: 0.0.40
codegen_flags: <defaults>
</compile_context>

<pallas_src>
import jax
import jax.numpy as jnp
from jax.experimental import pallas as pl
from jax.experimental.pallas import tpu as pltpu


# ----------------------------------------------------------------------------
# Pallas kernel: BiLSTM (last-step output) + fc1 + ReLU + fc2 * lev
# ----------------------------------------------------------------------------
def generator_kernel(x_ref,       # (T, TB, F)   time-major, batch tile
                     noise_ref,   # (TB, NS)
                     slabA_ref,   # (F+NS+1, 2*4H)  [wih_x | wih_n | b] fwd|bwd
                     slabB_ref,   # (3H+W+16, W)    [whh_f, w1f, w1b, w2p, b1p, b2p]
                     lev_ref,     # (TB, W)      lev pre-broadcast to W lanes
                     out_ref):    # (TB, W)      lane-dense output slab
    T, TB, F = x_ref.shape
    NS = noise_ref.shape[1]
    G = slabA_ref.shape[1] // 2          # 4H
    H = G // 4
    W = slabB_ref.shape[1]               # fc lane-pad width == output slab width

    # static row offsets inside slabB
    r_w1f = H
    r_w1b = 2 * H
    r_w2 = 3 * H
    r_b1 = 3 * H + W
    r_b2 = r_b1 + 8

    # ---- merged fwd|bwd input projection (one 256-wide MXU call each) -------
    x2 = x_ref[...].reshape(T * TB, F)                     # layout-preserving merge
    w_x = slabA_ref[0:F, :]                                # (F, 2G)  [fwd | bwd]
    w_n = slabA_ref[F:F + NS, :]                           # (NS, 2G)
    b_all = slabA_ref[F + NS:F + NS + 1, :]                # (1, 2G)  [b_f | b_b]

    xw = jnp.dot(x2, w_x, preferred_element_type=jnp.float32)          # (T*TB, 2G)
    nb = jnp.dot(noise_ref[...], w_n,
                 preferred_element_type=jnp.float32) + b_all           # (TB, 2G)
    # hoist the per-step bias add off the serial h-chain (one full-slab VPU add)
    xwb = xw + jnp.tile(nb, (T, 1))                                    # (T*TB, 2G)

    whh_f = slabB_ref[0:H, 0:G]                                        # (H, 4H)

    def gate_acts(gates):
        # PyTorch gate order along 4H: [i, f, g, o]; only activate the lanes
        # each nonlinearity actually needs (4H of EUP work, not 8H).
        sig_if = jax.nn.sigmoid(gates[:, 0:2 * H])
        g_t = jnp.tanh(gates[:, 2 * H:3 * H])
        o_s = jax.nn.sigmoid(gates[:, 3 * H:4 * H])
        return sig_if[:, 0:H], sig_if[:, H:2 * H], g_t, o_s

    # ---- forward direction: fully unrolled (T static), t = 0 peeled ---------
    # With h0 = c0 = 0: no h@Whh term and no forget-gate contribution.
    g0 = xwb[0:TB, 0:G]
    i0, _, gg0, o0 = gate_acts(g0)
    c = i0 * gg0
    h = o0 * jnp.tanh(c)
    for t in range(1, T):                                  # static unroll, aligned slices
        gates = xwb[t * TB:(t + 1) * TB, 0:G] + jnp.dot(
            h, whh_f, preferred_element_type=jnp.float32)
        i, f, gg, o = gate_acts(gates)
        c = f * c + i * gg
        h = o * jnp.tanh(c)
    h_fwd = h

    # ---- backward direction --------------------------------------------------
    # out[:, -1, H:2H] of a single-layer bidirectional LSTM equals the reverse
    # hidden after processing only x_{T-1} from the zero state: one step, no
    # Whh_b, no forget-gate term.
    gb = xwb[(T - 1) * TB:T * TB, G:2 * G]
    ib, _, ggb, ob = gate_acts(gb)
    h_bwd = ob * jnp.tanh(ib * ggb)

    # ---- fc_1 (split halves, lane-padded) -> ReLU -> fc_2 -> * lev -----------
    w1f = slabB_ref[r_w1f:r_w1f + H, :]                    # (H, W)
    w1b = slabB_ref[r_w1b:r_w1b + H, :]                    # (H, W)
    w2p = slabB_ref[r_w2:r_w2 + W, :]                      # (W, W)
    b1p = slabB_ref[r_b1:r_b1 + 1, :]                      # (1, W)
    b2p = slabB_ref[r_b2:r_b2 + 1, :]                      # (1, W)

    z1 = (jnp.dot(h_fwd, w1f, preferred_element_type=jnp.float32)
          + jnp.dot(h_bwd, w1b, preferred_element_type=jnp.float32)
          + b1p)
    z1 = jnp.maximum(z1, 0.0)                              # padded lanes stay 0
    z2 = jnp.dot(z1, w2p, preferred_element_type=jnp.float32) + b2p
    out_ref[...] = z2 * lev_ref[...]                       # (TB, W) lane-dense store


# ----------------------------------------------------------------------------
# Wrapper: operand packing, batch padding, batch grid
# ----------------------------------------------------------------------------
@jax.jit
def generator_forward(params, x, noise, lev):
    """x: (B, T, F) f32, noise: (B, NS) f32, lev: (B, 1) f32 -> (B, OUT) f32."""
    B, T, F = x.shape
    NS = noise.shape[1]
    H = params["whh_f"].shape[0]
    G = 4 * H
    FC = params["w1"].shape[1]
    OUT = params["w2"].shape[-1]
    W = max(128, G)                       # fc lane-pad width / output slab width

    # batch padding to >= 8 sublanes and a multiple of the batch tile
    TB = min(128, ((max(B, 8) + 7) // 8) * 8)
    B_pad = pl.cdiv(B, TB) * TB
    grid = (B_pad // TB,)

    x_tm = jnp.transpose(x.astype(jnp.float32), (1, 0, 2))       # (T, B, F)
    x_tm = jnp.pad(x_tm, ((0, 0), (0, B_pad - B), (0, 0)))
    noise_p = jnp.pad(noise.astype(jnp.float32), ((0, B_pad - B), (0, 0)))
    lev_p = jnp.pad(lev.astype(jnp.float32), ((0, B_pad - B), (0, 0)))
    lev_b = jnp.broadcast_to(lev_p, (B_pad, W))                  # pre-broadcast

    wih_f, wih_b = params["wih_f"], params["wih_b"]

    # Slab A: merged fwd|bwd projection weights + their biases (width 2*4H)
    slabA = jnp.zeros((F + NS + 1, 2 * G), jnp.float32)
    slabA = slabA.at[0:F, 0:G].set(wih_f[:F])
    slabA = slabA.at[0:F, G:].set(wih_b[:F])
    slabA = slabA.at[F:F + NS, 0:G].set(wih_f[F:])
    slabA = slabA.at[F:F + NS, G:].set(wih_b[F:])
    slabA = slabA.at[F + NS, 0:G].set(params["b_f"][0])
    slabA = slabA.at[F + NS, G:].set(params["b_b"][0])

    # Slab B: recurrent + fc weights, all lane-padded to W (width 128)
    r_b1 = 3 * H + W
    r_b2 = r_b1 + 8
    rows = r_b2 + 8
    slabB = jnp.zeros((rows, W), jnp.float32)
    slabB = slabB.at[0:H, 0:G].set(params["whh_f"])
    slabB = slabB.at[H:2 * H, 0:FC].set(params["w1"][:H])
    slabB = slabB.at[2 * H:3 * H, 0:FC].set(params["w1"][H:])
    slabB = slabB.at[3 * H:3 * H + FC, 0:OUT].set(params["w2"])
    slabB = slabB.at[r_b1, 0:FC].set(params["b1"][0])
    slabB = slabB.at[r_b2, 0:OUT].set(params["b2"][0])

    out_pad = pl.pallas_call(
        generator_kernel,
        out_shape=jax.ShapeDtypeStruct((B_pad, W), jnp.float32),
        grid_spec=pltpu.PrefetchScalarGridSpec(
            num_scalar_prefetch=0,
            grid=grid,
            in_specs=[
                pl.BlockSpec((T, TB, F), lambda i: (0, i, 0)),        # x (batch-tiled)
                pl.BlockSpec((TB, NS), lambda i: (i, 0)),             # noise
                pl.BlockSpec(slabA.shape, lambda i: (0, 0)),          # resident weights
                pl.BlockSpec(slabB.shape, lambda i: (0, 0)),          # resident weights
                pl.BlockSpec((TB, W), lambda i: (i, 0)),              # lev
            ],
            out_specs=pl.BlockSpec((TB, W), lambda i: (i, 0)),
        ),
        compiler_params=pltpu.CompilerParams(
            dimension_semantics=("parallel",)),                       # shards tiles over TCs (v7x)
    )(x_tm, noise_p, slabA, slabB, lev_b)

    return out_pad[:B, :OUT]


# ----------------------------------------------------------------------------
# levy_solver (Merton jump-diffusion style) — random-sampling glue in plain JAX
# ----------------------------------------------------------------------------
# TODO(synk): levy_solver source was not included in the module snippet; this
# implements the standard Merton-jump variant used by these Levy-GAN scripts.
def levy_solver(key, r, m, v, lam, sigma, T, steps, npaths):
    size = (steps, npaths)
    dt = float(T) / float(steps)
    k1, k2, k3, k4 = jax.random.split(key, 4)
    rates = jax.random.uniform(k1, size) * lam
    poi = jax.random.poisson(k2, rates).astype(jnp.float32)
    jumps = poi * (m + v * jax.random.normal(k3, size))
    drift = (r - sigma ** 2 / 2.0 - lam * (m + v ** 2 * 0.5)) * dt
    diff = sigma * jnp.sqrt(jnp.float32(dt)) * jax.random.normal(k4, size)
    geo = jnp.cumsum(drift + diff + jumps, axis=0)
    return jnp.exp(geo)                                  # (steps, npaths)


# ----------------------------------------------------------------------------
# Pure-JAX reference of the module forward (for a correctness check)
# ----------------------------------------------------------------------------
def reference_forward(params, x, noise, lev):
    B, T, F = x.shape
    H = params["whh_f"].shape[0]
    x_comb = jnp.concatenate(
        [x, jnp.broadcast_to(noise[:, None, :], (B, T, noise.shape[1]))], axis=-1)
    xs = jnp.transpose(x_comb, (1, 0, 2))                # (T, B, DIN)

    def lstm_scan(seq, wih, whh, b):
        def step(carry, xt):
            h, c = carry
            g = xt @ wih + h @ whh + b
            i = jax.nn.sigmoid(g[:, 0:H])
            f = jax.nn.sigmoid(g[:, H:2 * H])
            gg = jnp.tanh(g[:, 2 * H:3 * H])
            o = jax.nn.sigmoid(g[:, 3 * H:4 * H])
            c = f * c + i * gg
            h = o * jnp.tanh(c)
            return (h, c), h
        init = (jnp.zeros((B, H), jnp.float32), jnp.zeros((B, H), jnp.float32))
        (hT, _), hs = jax.lax.scan(step, init, seq)
        return hT, hs

    h_fwd, _ = lstm_scan(xs, params["wih_f"], params["whh_f"], params["b_f"])
    _, hs_rev = lstm_scan(xs[::-1], params["wih_b"], params["whh_b"], params["b_b"])
    h_bwd = hs_rev[0]                                    # reverse hidden at original t = T-1
    out = jnp.concatenate([h_fwd, h_bwd], axis=-1)
    z1 = jnp.maximum(out @ params["w1"] + params["b1"], 0.0)
    z2 = z1 @ params["w2"] + params["b2"]
    return z2 * lev


# ----------------------------------------------------------------------------
# Deterministic parameter construction (PyTorch-style uniform init)
# ----------------------------------------------------------------------------
def init_params(key, din, hidden, out_dim):
    def uni(k, shape, bound):
        return jax.random.uniform(k, shape, jnp.float32, -bound, bound)

    ks = jax.random.split(key, 16)
    kb = 1.0 / jnp.sqrt(hidden)
    return {
        # forward-direction LSTM (weights stored pre-transposed: (in, 4H))
        "wih_f": uni(ks[0], (din, 4 * hidden), kb),
        "whh_f": uni(ks[1], (hidden, 4 * hidden), kb),
        "b_f":   uni(ks[2], (1, 4 * hidden), kb) + uni(ks[3], (1, 4 * hidden), kb),
        # reverse-direction LSTM (whh_b only needed by the pure-JAX reference)
        "wih_b": uni(ks[4], (din, 4 * hidden), kb),
        "whh_b": uni(ks[5], (hidden, 4 * hidden), kb),
        "b_b":   uni(ks[6], (1, 4 * hidden), kb) + uni(ks[7], (1, 4 * hidden), kb),
        # fc_1: Linear(2H -> 12), fc_2: Linear(12 -> out_dim)
        "w1": uni(ks[8], (2 * hidden, 12), 1.0 / jnp.sqrt(2 * hidden)),
        "b1": uni(ks[9], (1, 12), 1.0 / jnp.sqrt(2 * hidden)),
        "w2": uni(ks[10], (12, out_dim), 1.0 / jnp.sqrt(12.0)),
        "b2": uni(ks[11], (1, out_dim), 1.0 / jnp.sqrt(12.0)),
        # non/learnable scalars from the module
        "r": jnp.float32(0.02), "m": jnp.float32(0.02), "v": jnp.float32(0.02),
        "lam": jnp.float32(0.02), "sigma": jnp.float32(0.02),
    }


if __name__ == "__main__":
    # small shapes consistent with the module
    B, SEQ_LEN, FEATURE_NO, NOISE_SIZE, HIDDEN, OUTPUT_DIM = 2, 8, 4, 4, 32, 4
    DIN = FEATURE_NO + NOISE_SIZE

    root = jax.random.PRNGKey(0)
    k_param, k_x, k_noise, k_lev = jax.random.split(root, 4)

    params = init_params(k_param, DIN, HIDDEN, OUTPUT_DIM)
    x = jax.random.normal(k_x, (B, SEQ_LEN, FEATURE_NO), jnp.float32)
    noise = jax.random.normal(k_noise, (B, NOISE_SIZE), jnp.float32)

    # lev = levy_solver(r, m, v, lam, sigma, output_dim, batch_size, 1) -> (B, 1)
    lev = levy_solver(k_lev, params["r"], params["m"], params["v"],
                      params["lam"], params["sigma"],
                      OUTPUT_DIM, B, 1)

    out = generator_forward(params, x, noise, lev)
    jax.block_until_ready(out)
    assert out.shape == (B, OUTPUT_DIM) and out.dtype == jnp.float32

    ref = reference_forward(params, x, noise, lev)
    assert bool(jnp.allclose(out, ref, rtol=2e-2, atol=2e-2)), \
        "Pallas kernel mismatch vs pure-JAX reference"
    print("KERNEL_OK")
</pallas_src>

<mosaic_0001>
module attributes {stable_mosaic.version = 11 : i64} {
  func.func @generator_kernel(%arg0: i32, %arg1: memref<8x8x4xf32, #tpu.memory_space<vmem>>, %arg2: memref<8x4xf32, #tpu.memory_space<vmem>>, %arg3: memref<9x256xf32, #tpu.memory_space<vmem>>, %arg4: memref<240x128xf32, #tpu.memory_space<vmem>>, %arg5: memref<8x128xf32, #tpu.memory_space<vmem>>, %arg6: memref<8x128xf32, #tpu.memory_space<vmem>>) attributes {dimension_semantics = [#tpu.dimension_semantics<parallel>], iteration_bounds = array<i64: 1>, scalar_prefetch = 0 : i64, scratch_operands = 0 : i64, tpu.core_type = #tpu.core_type<tc>, window_params = [{transform_indices = @transform_0, window_bounds = array<i64: 8, 8, 4>}, {transform_indices = @transform_1, window_bounds = array<i64: 8, 4>}, {pipeline_mode = #tpu.pipeline_mode<synchronous>, transform_indices = @transform_2, window_bounds = array<i64: 9, 256>}, {pipeline_mode = #tpu.pipeline_mode<synchronous>, transform_indices = @transform_3, window_bounds = array<i64: 240, 128>}, {transform_indices = @transform_4, window_bounds = array<i64: 8, 128>}, {transform_indices = @transform_5, window_bounds = array<i64: 8, 128>}]} {
    %c0 = arith.constant 0 : index
    %c0_0 = arith.constant 0 : index
    %c0_1 = arith.constant 0 : index
    %0 = vector.load %arg1[%c0, %c0_0, %c0_1] : memref<8x8x4xf32, #tpu.memory_space<vmem>>, vector<8x8x4xf32>
    %1 = vector.shape_cast %0 : vector<8x8x4xf32> to vector<64x4xf32>
    %c0_2 = arith.constant 0 : index
    %c0_3 = arith.constant 0 : index
    %2 = vector.load %arg3[%c0_2, %c0_3] : memref<9x256xf32, #tpu.memory_space<vmem>>, vector<4x256xf32>
    %c4 = arith.constant 4 : index
    %c0_4 = arith.constant 0 : index
    %3 = vector.load %arg3[%c4, %c0_4] : memref<9x256xf32, #tpu.memory_space<vmem>>, vector<4x256xf32>
    %c8 = arith.constant 8 : index
    %c0_5 = arith.constant 0 : index
    %4 = vector.load %arg3[%c8, %c0_5] : memref<9x256xf32, #tpu.memory_space<vmem>>, vector<1x256xf32>
    %cst = arith.constant dense<0.000000e+00> : vector<64x256xf32>
    %5 = tpu.matmul %1, %2, %cst {dimension_numbers = #tpu.dot_dimension_numbers<[1], [0], [0], [1], [0, 0, 1, 1], [], []>} : vector<64x4xf32>, vector<4x256xf32>, vector<64x256xf32> -> vector<64x256xf32>
    %c0_6 = arith.constant 0 : index
    %c0_7 = arith.constant 0 : index
    %6 = vector.load %arg2[%c0_6, %c0_7] : memref<8x4xf32, #tpu.memory_space<vmem>>, vector<8x4xf32>
    %cst_8 = arith.constant dense<0.000000e+00> : vector<8x256xf32>
    %7 = tpu.matmul %6, %3, %cst_8 {dimension_numbers = #tpu.dot_dimension_numbers<[1], [0], [0], [1], [0, 0, 1, 1], [], []>} : vector<8x4xf32>, vector<4x256xf32>, vector<8x256xf32> -> vector<8x256xf32>
    %8 = vector.broadcast %4 : vector<1x256xf32> to vector<8x256xf32>
    %9 = arith.addf %7, %8 : vector<8x256xf32>
    %10 = tpu.concatenate %9, %9, %9, %9, %9, %9, %9, %9 in 0 : vector<8x256xf32>, vector<8x256xf32>, vector<8x256xf32>, vector<8x256xf32>, vector<8x256xf32>, vector<8x256xf32>, vector<8x256xf32>, vector<8x256xf32> -> vector<64x256xf32>
    %11 = arith.addf %5, %10 : vector<64x256xf32>
    %c0_9 = arith.constant 0 : index
    %c0_10 = arith.constant 0 : index
    %12 = vector.load %arg4[%c0_9, %c0_10] : memref<240x128xf32, #tpu.memory_space<vmem>>, vector<32x128xf32>
    %13 = vector.extract_strided_slice %11 {offsets = [0, 0], sizes = [8, 128], strides = [1, 1]} : vector<64x256xf32> to vector<8x128xf32>
    %14 = vector.extract_strided_slice %13 {offsets = [0, 0], sizes = [8, 64], strides = [1, 1]} : vector<8x128xf32> to vector<8x64xf32>
    %15 = arith.negf %14 : vector<8x64xf32>
    %16 = math.exp %15 : vector<8x64xf32>
    %cst_11 = arith.constant 1.000000e+00 : f32
    %17 = vector.broadcast %cst_11 : f32 to vector<8x64xf32>
    %18 = arith.addf %17, %16 : vector<8x64xf32>
    %19 = arith.divf %17, %18 : vector<8x64xf32>
    %20 = vector.extract_strided_slice %13 {offsets = [0, 64], sizes = [8, 32], strides = [1, 1]} : vector<8x128xf32> to vector<8x32xf32>
    %21 = math.tanh %20 : vector<8x32xf32>
    %22 = vector.extract_strided_slice %13 {offsets = [0, 96], sizes = [8, 32], strides = [1, 1]} : vector<8x128xf32> to vector<8x32xf32>
    %23 = arith.negf %22 : vector<8x32xf32>
    %24 = math.exp %23 : vector<8x32xf32>
    %cst_12 = arith.constant 1.000000e+00 : f32
    %25 = vector.broadcast %cst_12 : f32 to vector<8x32xf32>
    %26 = arith.addf %25, %24 : vector<8x32xf32>
    %27 = arith.divf %25, %26 : vector<8x32xf32>
    %28 = vector.extract_strided_slice %19 {offsets = [0, 0], sizes = [8, 32], strides = [1, 1]} : vector<8x64xf32> to vector<8x32xf32>
    %29 = arith.mulf %28, %21 : vector<8x32xf32>
    %30 = math.tanh %29 : vector<8x32xf32>
    %31 = arith.mulf %27, %30 : vector<8x32xf32>
    %32 = vector.extract_strided_slice %11 {offsets = [8, 0], sizes = [8, 128], strides = [1, 1]} : vector<64x256xf32> to vector<8x128xf32>
    %cst_13 = arith.constant dense<0.000000e+00> : vector<8x128xf32>
    %33 = tpu.matmul %31, %12, %cst_13 {dimension_numbers = #tpu.dot_dimension_numbers<[1], [0], [0], [1], [0, 0, 1, 1], [], []>} : vector<8x32xf32>, vector<32x128xf32>, vector<8x128xf32> -> vector<8x128xf32>
    %34 = arith.addf %32, %33 : vector<8x128xf32>
    %35 = vector.extract_strided_slice %34 {offsets = [0, 0], sizes = [8, 64], strides = [1, 1]} : vector<8x128xf32> to vector<8x64xf32>
    %36 = arith.negf %35 : vector<8x64xf32>
    %37 = math.exp %36 : vector<8x64xf32>
    %cst_14 = arith.constant 1.000000e+00 : f32
    %38 = vector.broadcast %cst_14 : f32 to vector<8x64xf32>
    %39 = arith.addf %38, %37 : vector<8x64xf32>
    %40 = arith.divf %38, %39 : vector<8x64xf32>
    %41 = vector.extract_strided_slice %34 {offsets = [0, 64], sizes = [8, 32], strides = [1, 1]} : vector<8x128xf32> to vector<8x32xf32>
    %42 = math.tanh %41 : vector<8x32xf32>
    %43 = vector.extract_strided_slice %34 {offsets = [0, 96], sizes = [8, 32], strides = [1, 1]} : vector<8x128xf32> to vector<8x32xf32>
    %44 = arith.negf %43 : vector<8x32xf32>
    %45 = math.exp %44 : vector<8x32xf32>
    %cst_15 = arith.constant 1.000000e+00 : f32
    %46 = vector.broadcast %cst_15 : f32 to vector<8x32xf32>
    %47 = arith.addf %46, %45 : vector<8x32xf32>
    %48 = arith.divf %46, %47 : vector<8x32xf32>
    %49 = vector.extract_strided_slice %40 {offsets = [0, 0], sizes = [8, 32], strides = [1, 1]} : vector<8x64xf32> to vector<8x32xf32>
    %50 = vector.extract_strided_slice %40 {offsets = [0, 32], sizes = [8, 32], strides = [1, 1]} : vector<8x64xf32> to vector<8x32xf32>
    %51 = arith.mulf %50, %29 : vector<8x32xf32>
    %52 = arith.mulf %49, %42 : vector<8x32xf32>
    %53 = arith.addf %51, %52 : vector<8x32xf32>
    %54 = math.tanh %53 : vector<8x32xf32>
    %55 = arith.mulf %48, %54 : vector<8x32xf32>
    %56 = vector.extract_strided_slice %11 {offsets = [16, 0], sizes = [8, 128], strides = [1, 1]} : vector<64x256xf32> to vector<8x128xf32>
    %cst_16 = arith.constant dense<0.000000e+00> : vector<8x128xf32>
    %57 = tpu.matmul %55, %12, %cst_16 {dimension_numbers = #tpu.dot_dimension_numbers<[1], [0], [0], [1], [0, 0, 1, 1], [], []>} : vector<8x32xf32>, vector<32x128xf32>, vector<8x128xf32> -> vector<8x128xf32>
    %58 = arith.addf %56, %57 : vector<8x128xf32>
    %59 = vector.extract_strided_slice %58 {offsets = [0, 0], sizes = [8, 64], strides = [1, 1]} : vector<8x128xf32> to vector<8x64xf32>
    %60 = arith.negf %59 : vector<8x64xf32>
    %61 = math.exp %60 : vector<8x64xf32>
    %cst_17 = arith.constant 1.000000e+00 : f32
    %62 = vector.broadcast %cst_17 : f32 to vector<8x64xf32>
    %63 = arith.addf %62, %61 : vector<8x64xf32>
    %64 = arith.divf %62, %63 : vector<8x64xf32>
    %65 = vector.extract_strided_slice %58 {offsets = [0, 64], sizes = [8, 32], strides = [1, 1]} : vector<8x128xf32> to vector<8x32xf32>
    %66 = math.tanh %65 : vector<8x32xf32>
    %67 = vector.extract_strided_slice %58 {offsets = [0, 96], sizes = [8, 32], strides = [1, 1]} : vector<8x128xf32> to vector<8x32xf32>
    %68 = arith.negf %67 : vector<8x32xf32>
    %69 = math.exp %68 : vector<8x32xf32>
    %cst_18 = arith.constant 1.000000e+00 : f32
    %70 = vector.broadcast %cst_18 : f32 to vector<8x32xf32>
    %71 = arith.addf %70, %69 : vector<8x32xf32>
    %72 = arith.divf %70, %71 : vector<8x32xf32>
    %73 = vector.extract_strided_slice %64 {offsets = [0, 0], sizes = [8, 32], strides = [1, 1]} : vector<8x64xf32> to vector<8x32xf32>
    %74 = vector.extract_strided_slice %64 {offsets = [0, 32], sizes = [8, 32], strides = [1, 1]} : vector<8x64xf32> to vector<8x32xf32>
    %75 = arith.mulf %74, %53 : vector<8x32xf32>
    %76 = arith.mulf %73, %66 : vector<8x32xf32>
    %77 = arith.addf %75, %76 : vector<8x32xf32>
    %78 = math.tanh %77 : vector<8x32xf32>
    %79 = arith.mulf %72, %78 : vector<8x32xf32>
    %80 = vector.extract_strided_slice %11 {offsets = [24, 0], sizes = [8, 128], strides = [1, 1]} : vector<64x256xf32> to vector<8x128xf32>
    %cst_19 = arith.constant dense<0.000000e+00> : vector<8x128xf32>
    %81 = tpu.matmul %79, %12, %cst_19 {dimension_numbers = #tpu.dot_dimension_numbers<[1], [0], [0], [1], [0, 0, 1, 1], [], []>} : vector<8x32xf32>, vector<32x128xf32>, vector<8x128xf32> -> vector<8x128xf32>
    %82 = arith.addf %80, %81 : vector<8x128xf32>
    %83 = vector.extract_strided_slice %82 {offsets = [0, 0], sizes = [8, 64], strides = [1, 1]} : vector<8x128xf32> to vector<8x64xf32>
    %84 = arith.negf %83 : vector<8x64xf32>
    %85 = math.exp %84 : vector<8x64xf32>
    %cst_20 = arith.constant 1.000000e+00 : f32
    %86 = vector.broadcast %cst_20 : f32 to vector<8x64xf32>
    %87 = arith.addf %86, %85 : vector<8x64xf32>
    %88 = arith.divf %86, %87 : vector<8x64xf32>
    %89 = vector.extract_strided_slice %82 {offsets = [0, 64], sizes = [8, 32], strides = [1, 1]} : vector<8x128xf32> to vector<8x32xf32>
    %90 = math.tanh %89 : vector<8x32xf32>
    %91 = vector.extract_strided_slice %82 {offsets = [0, 96], sizes = [8, 32], strides = [1, 1]} : vector<8x128xf32> to vector<8x32xf32>
    %92 = arith.negf %91 : vector<8x32xf32>
    %93 = math.exp %92 : vector<8x32xf32>
    %cst_21 = arith.constant 1.000000e+00 : f32
    %94 = vector.broadcast %cst_21 : f32 to vector<8x32xf32>
    %95 = arith.addf %94, %93 : vector<8x32xf32>
    %96 = arith.divf %94, %95 : vector<8x32xf32>
    %97 = vector.extract_strided_slice %88 {offsets = [0, 0], sizes = [8, 32], strides = [1, 1]} : vector<8x64xf32> to vector<8x32xf32>
    %98 = vector.extract_strided_slice %88 {offsets = [0, 32], sizes = [8, 32], strides = [1, 1]} : vector<8x64xf32> to vector<8x32xf32>
    %99 = arith.mulf %98, %77 : vector<8x32xf32>
    %100 = arith.mulf %97, %90 : vector<8x32xf32>
    %101 = arith.addf %99, %100 : vector<8x32xf32>
    %102 = math.tanh %101 : vector<8x32xf32>
    %103 = arith.mulf %96, %102 : vector<8x32xf32>
    %104 = vector.extract_strided_slice %11 {offsets = [32, 0], sizes = [8, 128], strides = [1, 1]} : vector<64x256xf32> to vector<8x128xf32>
    %cst_22 = arith.constant dense<0.000000e+00> : vector<8x128xf32>
    %105 = tpu.matmul %103, %12, %cst_22 {dimension_numbers = #tpu.dot_dimension_numbers<[1], [0], [0], [1], [0, 0, 1, 1], [], []>} : vector<8x32xf32>, vector<32x128xf32>, vector<8x128xf32> -> vector<8x128xf32>
    %106 = arith.addf %104, %105 : vector<8x128xf32>
    %107 = vector.extract_strided_slice %106 {offsets = [0, 0], sizes = [8, 64], strides = [1, 1]} : vector<8x128xf32> to vector<8x64xf32>
    %108 = arith.negf %107 : vector<8x64xf32>
    %109 = math.exp %108 : vector<8x64xf32>
    %cst_23 = arith.constant 1.000000e+00 : f32
    %110 = vector.broadcast %cst_23 : f32 to vector<8x64xf32>
    %111 = arith.addf %110, %109 : vector<8x64xf32>
    %112 = arith.divf %110, %111 : vector<8x64xf32>
    %113 = vector.extract_strided_slice %106 {offsets = [0, 64], sizes = [8, 32], strides = [1, 1]} : vector<8x128xf32> to vector<8x32xf32>
    %114 = math.tanh %113 : vector<8x32xf32>
    %115 = vector.extract_strided_slice %106 {offsets = [0, 96], sizes = [8, 32], strides = [1, 1]} : vector<8x128xf32> to vector<8x32xf32>
    %116 = arith.negf %115 : vector<8x32xf32>
    %117 = math.exp %116 : vector<8x32xf32>
    %cst_24 = arith.constant 1.000000e+00 : f32
    %118 = vector.broadcast %cst_24 : f32 to vector<8x32xf32>
    %119 = arith.addf %118, %117 : vector<8x32xf32>
    %120 = arith.divf %118, %119 : vector<8x32xf32>
    %121 = vector.extract_strided_slice %112 {offsets = [0, 0], sizes = [8, 32], strides = [1, 1]} : vector<8x64xf32> to vector<8x32xf32>
    %122 = vector.extract_strided_slice %112 {offsets = [0, 32], sizes = [8, 32], strides = [1, 1]} : vector<8x64xf32> to vector<8x32xf32>
    %123 = arith.mulf %122, %101 : vector<8x32xf32>
    %124 = arith.mulf %121, %114 : vector<8x32xf32>
    %125 = arith.addf %123, %124 : vector<8x32xf32>
    %126 = math.tanh %125 : vector<8x32xf32>
    %127 = arith.mulf %120, %126 : vector<8x32xf32>
    %128 = vector.extract_strided_slice %11 {offsets = [40, 0], sizes = [8, 128], strides = [1, 1]} : vector<64x256xf32> to vector<8x128xf32>
    %cst_25 = arith.constant dense<0.000000e+00> : vector<8x128xf32>
    %129 = tpu.matmul %127, %12, %cst_25 {dimension_numbers = #tpu.dot_dimension_numbers<[1], [0], [0], [1], [0, 0, 1, 1], [], []>} : vector<8x32xf32>, vector<32x128xf32>, vector<8x128xf32> -> vector<8x128xf32>
    %130 = arith.addf %128, %129 : vector<8x128xf32>
    %131 = vector.extract_strided_slice %130 {offsets = [0, 0], sizes = [8, 64], strides = [1, 1]} : vector<8x128xf32> to vector<8x64xf32>
    %132 = arith.negf %131 : vector<8x64xf32>
    %133 = math.exp %132 : vector<8x64xf32>
    %cst_26 = arith.constant 1.000000e+00 : f32
    %134 = vector.broadcast %cst_26 : f32 to vector<8x64xf32>
    %135 = arith.addf %134, %133 : vector<8x64xf32>
    %136 = arith.divf %134, %135 : vector<8x64xf32>
    %137 = vector.extract_strided_slice %130 {offsets = [0, 64], sizes = [8, 32], strides = [1, 1]} : vector<8x128xf32> to vector<8x32xf32>
    %138 = math.tanh %137 : vector<8x32xf32>
    %139 = vector.extract_strided_slice %130 {offsets = [0, 96], sizes = [8, 32], strides = [1, 1]} : vector<8x128xf32> to vector<8x32xf32>
    %140 = arith.negf %139 : vector<8x32xf32>
    %141 = math.exp %140 : vector<8x32xf32>
    %cst_27 = arith.constant 1.000000e+00 : f32
    %142 = vector.broadcast %cst_27 : f32 to vector<8x32xf32>
    %143 = arith.addf %142, %141 : vector<8x32xf32>
    %144 = arith.divf %142, %143 : vector<8x32xf32>
    %145 = vector.extract_strided_slice %136 {offsets = [0, 0], sizes = [8, 32], strides = [1, 1]} : vector<8x64xf32> to vector<8x32xf32>
    %146 = vector.extract_strided_slice %136 {offsets = [0, 32], sizes = [8, 32], strides = [1, 1]} : vector<8x64xf32> to vector<8x32xf32>
    %147 = arith.mulf %146, %125 : vector<8x32xf32>
    %148 = arith.mulf %145, %138 : vector<8x32xf32>
    %149 = arith.addf %147, %148 : vector<8x32xf32>
    %150 = math.tanh %149 : vector<8x32xf32>
    %151 = arith.mulf %144, %150 : vector<8x32xf32>
    %152 = vector.extract_strided_slice %11 {offsets = [48, 0], sizes = [8, 128], strides = [1, 1]} : vector<64x256xf32> to vector<8x128xf32>
    %cst_28 = arith.constant dense<0.000000e+00> : vector<8x128xf32>
    %153 = tpu.matmul %151, %12, %cst_28 {dimension_numbers = #tpu.dot_dimension_numbers<[1], [0], [0], [1], [0, 0, 1, 1], [], []>} : vector<8x32xf32>, vector<32x128xf32>, vector<8x128xf32> -> vector<8x128xf32>
    %154 = arith.addf %152, %153 : vector<8x128xf32>
    %155 = vector.extract_strided_slice %154 {offsets = [0, 0], sizes = [8, 64], strides = [1, 1]} : vector<8x128xf32> to vector<8x64xf32>
    %156 = arith.negf %155 : vector<8x64xf32>
    %157 = math.exp %156 : vector<8x64xf32>
    %cst_29 = arith.constant 1.000000e+00 : f32
    %158 = vector.broadcast %cst_29 : f32 to vector<8x64xf32>
    %159 = arith.addf %158, %157 : vector<8x64xf32>
    %160 = arith.divf %158, %159 : vector<8x64xf32>
    %161 = vector.extract_strided_slice %154 {offsets = [0, 64], sizes = [8, 32], strides = [1, 1]} : vector<8x128xf32> to vector<8x32xf32>
    %162 = math.tanh %161 : vector<8x32xf32>
    %163 = vector.extract_strided_slice %154 {offsets = [0, 96], sizes = [8, 32], strides = [1, 1]} : vector<8x128xf32> to vector<8x32xf32>
    %164 = arith.negf %163 : vector<8x32xf32>
    %165 = math.exp %164 : vector<8x32xf32>
    %cst_30 = arith.constant 1.000000e+00 : f32
    %166 = vector.broadcast %cst_30 : f32 to vector<8x32xf32>
    %167 = arith.addf %166, %165 : vector<8x32xf32>
    %168 = arith.divf %166, %167 : vector<8x32xf32>
    %169 = vector.extract_strided_slice %160 {offsets = [0, 0], sizes = [8, 32], strides = [1, 1]} : vector<8x64xf32> to vector<8x32xf32>
    %170 = vector.extract_strided_slice %160 {offsets = [0, 32], sizes = [8, 32], strides = [1, 1]} : vector<8x64xf32> to vector<8x32xf32>
    %171 = arith.mulf %170, %149 : vector<8x32xf32>
    %172 = arith.mulf %169, %162 : vector<8x32xf32>
    %173 = arith.addf %171, %172 : vector<8x32xf32>
    %174 = math.tanh %173 : vector<8x32xf32>
    %175 = arith.mulf %168, %174 : vector<8x32xf32>
    %176 = vector.extract_strided_slice %11 {offsets = [56, 0], sizes = [8, 128], strides = [1, 1]} : vector<64x256xf32> to vector<8x128xf32>
    %cst_31 = arith.constant dense<0.000000e+00> : vector<8x128xf32>
    %177 = tpu.matmul %175, %12, %cst_31 {dimension_numbers = #tpu.dot_dimension_numbers<[1], [0], [0], [1], [0, 0, 1, 1], [], []>} : vector<8x32xf32>, vector<32x128xf32>, vector<8x128xf32> -> vector<8x128xf32>
    %178 = arith.addf %176, %177 : vector<8x128xf32>
    %179 = vector.extract_strided_slice %178 {offsets = [0, 0], sizes = [8, 64], strides = [1, 1]} : vector<8x128xf32> to vector<8x64xf32>
    %180 = arith.negf %179 : vector<8x64xf32>
    %181 = math.exp %180 : vector<8x64xf32>
    %cst_32 = arith.constant 1.000000e+00 : f32
    %182 = vector.broadcast %cst_32 : f32 to vector<8x64xf32>
    %183 = arith.addf %182, %181 : vector<8x64xf32>
    %184 = arith.divf %182, %183 : vector<8x64xf32>
    %185 = vector.extract_strided_slice %178 {offsets = [0, 64], sizes = [8, 32], strides = [1, 1]} : vector<8x128xf32> to vector<8x32xf32>
    %186 = math.tanh %185 : vector<8x32xf32>
    %187 = vector.extract_strided_slice %178 {offsets = [0, 96], sizes = [8, 32], strides = [1, 1]} : vector<8x128xf32> to vector<8x32xf32>
    %188 = arith.negf %187 : vector<8x32xf32>
    %189 = math.exp %188 : vector<8x32xf32>
    %cst_33 = arith.constant 1.000000e+00 : f32
    %190 = vector.broadcast %cst_33 : f32 to vector<8x32xf32>
    %191 = arith.addf %190, %189 : vector<8x32xf32>
    %192 = arith.divf %190, %191 : vector<8x32xf32>
    %193 = vector.extract_strided_slice %184 {offsets = [0, 0], sizes = [8, 32], strides = [1, 1]} : vector<8x64xf32> to vector<8x32xf32>
    %194 = vector.extract_strided_slice %184 {offsets = [0, 32], sizes = [8, 32], strides = [1, 1]} : vector<8x64xf32> to vector<8x32xf32>
    %195 = arith.mulf %194, %173 : vector<8x32xf32>
    %196 = arith.mulf %193, %186 : vector<8x32xf32>
    %197 = arith.addf %195, %196 : vector<8x32xf32>
    %198 = math.tanh %197 : vector<8x32xf32>
    %199 = arith.mulf %192, %198 : vector<8x32xf32>
    %200 = vector.extract_strided_slice %11 {offsets = [56, 128], sizes = [8, 128], strides = [1, 1]} : vector<64x256xf32> to vector<8x128xf32>
    %201 = vector.extract_strided_slice %200 {offsets = [0, 0], sizes = [8, 64], strides = [1, 1]} : vector<8x128xf32> to vector<8x64xf32>
    %202 = arith.negf %201 : vector<8x64xf32>
    %203 = math.exp %202 : vector<8x64xf32>
    %cst_34 = arith.constant 1.000000e+00 : f32
    %204 = vector.broadcast %cst_34 : f32 to vector<8x64xf32>
    %205 = arith.addf %204, %203 : vector<8x64xf32>
    %206 = arith.divf %204, %205 : vector<8x64xf32>
    %207 = vector.extract_strided_slice %200 {offsets = [0, 64], sizes = [8, 32], strides = [1, 1]} : vector<8x128xf32> to vector<8x32xf32>
    %208 = math.tanh %207 : vector<8x32xf32>
    %209 = vector.extract_strided_slice %200 {offsets = [0, 96], sizes = [8, 32], strides = [1, 1]} : vector<8x128xf32> to vector<8x32xf32>
    %210 = arith.negf %209 : vector<8x32xf32>
    %211 = math.exp %210 : vector<8x32xf32>
    %cst_35 = arith.constant 1.000000e+00 : f32
    %212 = vector.broadcast %cst_35 : f32 to vector<8x32xf32>
    %213 = arith.addf %212, %211 : vector<8x32xf32>
    %214 = arith.divf %212, %213 : vector<8x32xf32>
    %215 = vector.extract_strided_slice %206 {offsets = [0, 0], sizes = [8, 32], strides = [1, 1]} : vector<8x64xf32> to vector<8x32xf32>
    %216 = arith.mulf %215, %208 : vector<8x32xf32>
    %217 = math.tanh %216 : vector<8x32xf32>
    %218 = arith.mulf %214, %217 : vector<8x32xf32>
    %c32 = arith.constant 32 : index
    %c0_36 = arith.constant 0 : index
    %219 = vector.load %arg4[%c32, %c0_36] : memref<240x128xf32, #tpu.memory_space<vmem>>, vector<32x128xf32>
    %c64 = arith.constant 64 : index
    %c0_37 = arith.constant 0 : index
    %220 = vector.load %arg4[%c64, %c0_37] : memref<240x128xf32, #tpu.memory_space<vmem>>, vector<32x128xf32>
    %c96 = arith.constant 96 : index
    %c0_38 = arith.constant 0 : index
    %221 = vector.load %arg4[%c96, %c0_38] : memref<240x128xf32, #tpu.memory_space<vmem>>, vector<128x128xf32>
    %c224 = arith.constant 224 : index
    %c0_39 = arith.constant 0 : index
    %222 = vector.load %arg4[%c224, %c0_39] : memref<240x128xf32, #tpu.memory_space<vmem>>, vector<1x128xf32>
    %c232 = arith.constant 232 : index
    %c0_40 = arith.constant 0 : index
    %223 = vector.load %arg4[%c232, %c0_40] : memref<240x128xf32, #tpu.memory_space<vmem>>, vector<1x128xf32>
    %cst_41 = arith.constant dense<0.000000e+00> : vector<8x128xf32>
    %224 = tpu.matmul %199, %219, %cst_41 {dimension_numbers = #tpu.dot_dimension_numbers<[1], [0], [0], [1], [0, 0, 1, 1], [], []>} : vector<8x32xf32>, vector<32x128xf32>, vector<8x128xf32> -> vector<8x128xf32>
    %cst_42 = arith.constant dense<0.000000e+00> : vector<8x128xf32>
    %225 = tpu.matmul %218, %220, %cst_42 {dimension_numbers = #tpu.dot_dimension_numbers<[1], [0], [0], [1], [0, 0, 1, 1], [], []>} : vector<8x32xf32>, vector<32x128xf32>, vector<8x128xf32> -> vector<8x128xf32>
    %226 = arith.addf %224, %225 : vector<8x128xf32>
    %227 = vector.broadcast %222 : vector<1x128xf32> to vector<8x128xf32>
    %228 = arith.addf %226, %227 : vector<8x128xf32>
    %cst_43 = arith.constant 0.000000e+00 : f32
    %229 = vector.broadcast %cst_43 : f32 to vector<8x128xf32>
    %230 = arith.maximumf %228, %229 : vector<8x128xf32>
    %cst_44 = arith.constant dense<0.000000e+00> : vector<8x128xf32>
    %231 = tpu.matmul %230, %221, %cst_44 {dimension_numbers = #tpu.dot_dimension_numbers<[1], [0], [0], [1], [0, 0, 1, 1], [], []>} : vector<8x128xf32>, vector<128x128xf32>, vector<8x128xf32> -> vector<8x128xf32>
    %232 = vector.broadcast %223 : vector<1x128xf32> to vector<8x128xf32>
    %233 = arith.addf %231, %232 : vector<8x128xf32>
    %c0_45 = arith.constant 0 : index
    %c0_46 = arith.constant 0 : index
    %234 = vector.load %arg5[%c0_45, %c0_46] : memref<8x128xf32, #tpu.memory_space<vmem>>, vector<8x128xf32>
    %235 = arith.mulf %233, %234 : vector<8x128xf32>
    %c0_47 = arith.constant 0 : index
    %c0_48 = arith.constant 0 : index
    %236 = vector.load %arg6[%c0_47, %c0_48] : memref<8x128xf32, #tpu.memory_space<vmem>>, vector<8x128xf32>
    tpu.vector_store %arg6[%c0_47, %c0_48], %235 {strides = array<i32>} : memref<8x128xf32, #tpu.memory_space<vmem>>, vector<8x128xf32>,
    return
  }
  func.func @transform_0(%arg0: i32) -> (i32, i32, i32) {
    %c0_i32 = arith.constant 0 : i32
    %c0_i32_0 = arith.constant 0 : i32
    %c0_i32_1 = arith.constant 0 : i32
    return %c0_i32, %arg0, %c0_i32_0 : i32, i32, i32
  }
  func.func @transform_1(%arg0: i32) -> (i32, i32) {
    %c0_i32 = arith.constant 0 : i32
    %c0_i32_0 = arith.constant 0 : i32
    return %arg0, %c0_i32 : i32, i32
  }
  func.func @transform_2(%arg0: i32) -> (i32, i32) {
    %c0_i32 = arith.constant 0 : i32
    %c0_i32_0 = arith.constant 0 : i32
    %c0_i32_1 = arith.constant 0 : i32
    return %c0_i32, %c0_i32_0 : i32, i32
  }
  func.func @transform_3(%arg0: i32) -> (i32, i32) {
    %c0_i32 = arith.constant 0 : i32
    %c0_i32_0 = arith.constant 0 : i32
    %c0_i32_1 = arith.constant 0 : i32
    return %c0_i32, %c0_i32_0 : i32, i32
  }
  func.func @transform_4(%arg0: i32) -> (i32, i32) {
    %c0_i32 = arith.constant 0 : i32
    %c0_i32_0 = arith.constant 0 : i32
    return %arg0, %c0_i32 : i32, i32
  }
  func.func @transform_5(%arg0: i32) -> (i32, i32) {
    %c0_i32 = arith.constant 0 : i32
    %c0_i32_0 = arith.constant 0 : i32
    return %arg0, %c0_i32 : i32, i32
  }
}

</mosaic_0001>

<bundles_post_ra>
// kernel: generator_forward.1
= control target key start
LH: loop header
LB: loop body
LE: loop exit
PB: predicated region body
PF: predicated region fallthrough
CT: control target
= control target key end

     0   :  { %vm48_vm0 = vcmask 1043456   ;;  %vm44_vm1 = vcmask 31744   ;;  %s936_s16 = smov 32   ;;  %s937_s17 = smov 96   ;;  %vm236_vm6 = vcmask 261120   ;;  %s1269_s2 = inlined_call_operand.vmem [shape: f32[9,256], index: 2, kind: input, shape index: {}]   ;;  %s1270_s0 = inlined_call_operand.vmem [shape: f32[8,8,4], index: 0, kind: input, shape index: {}]   ;;  %s1271_s1 = inlined_call_operand.vmem [shape: f32[8,4], index: 1, kind: input, shape index: {}]   ;;  %s1272_s3 = inlined_call_operand.vmem [shape: f32[240,128], index: 3, kind: input, shape index: {}]   ;;  %s1273_s4 = inlined_call_operand.vmem [shape: f32[8,128], index: 4, kind: input, shape index: {}]   ;;  %s1274_s5 = inlined_call_operand.vmem [shape: f32[8,128], index: 5, kind: output, shape index: {}]  }
   0x1   :  { %v28_v0 = vld [vmem:[%s1269_s2] sm:$0xf]  ;;  %v30_v2 = vld [vmem:[%s1269_s2] sm:$0xf0]  ;;  %v993_v5 = vld [vmem:[%s1270_s0 + $0x8] sm:$0xff] }
   0x2   :  { %v974_v1 = vld [vmem:[%s1270_s0] sm:$0xff]  ;;  %822 = vmatpush.msk.msra.mxu2 %vm48_vm0, %v28_v0  ;;  %v42_v3 = vrot.slane %v30_v2, 4  ;;  %v1000_v6 = vld [vmem:[%s1270_s0 + $0x10] sm:$0xff]  ;;  %v1007_v7 = vld [vmem:[%s1270_s0 + $0x18] sm:$0xff] }
   0x3   :  { %v983_v4 = vld [vmem:[%s1271_s1] sm:$0xff]  ;;  %823 = vmatmul.msk.f32.vlgmr.msra.gmra.mxu2 %vm44_vm1, %v974_v1  ;;  %v1021_v9 = vld [vmem:[%s1270_s0 + $0x28] sm:$0xff]  ;;  %v1028_v10 = vld [vmem:[%s1270_s0 + $0x30] sm:$0xff] }
   0x4   :  { %818 = vmatpush.msk.msra.mxu0 %vm48_vm0, %v42_v3  ;;  %v1014_v8 = vld [vmem:[%s1270_s0 + $0x20] sm:$0xff]  ;;  %v1035_v11 = vld [vmem:[%s1270_s0 + $0x38] sm:$0xff]  ;;  %s935_s0 = smov 64   ;;  %v1059_v36 = vld [vmem:[%s1272_s3 + $0x10] sm:$0xff] }
   0x5   :  { %819 = vmatmul.msk.f32.vlgmr.msra.gmra.mxu0 %vm44_vm1, %v983_v4  ;;  %v1042_v12 = vld [vmem:[%s1269_s2 + $0x10] ss:$8 sm:$0x3]  ;;  %v1065_v37 = vld [vmem:[%s1272_s3 + $0x8] sm:$0xff]  ;;  %v1071_v38 = vld [vmem:[%s1272_s3] sm:$0xff] }
   0x6   :  { %v36_v13 = vperm.slane %v1042_v12, 0  ;;  %v1054_v35 = vld [vmem:[%s1272_s3 + $0x18] sm:$0xff] }
   0x7   :  { %251 = vmatpush.msrb.mxu0 %v1054_v35 }
   0x9   :  { %252 = vmatpush.msrb.mxu0 %v1059_v36 }
   0xb   :  { %824 = vmatmul.msk.f32.gmra.mxu2 %vm44_vm1, %v993_v5  ;;  %253 = vmatpush.msrb.mxu0 %v1065_v37 }
   0xd   :  { %254 = vmatpush.msrb.mxu0 %v1071_v38 }
   0xf   :  { %318 = vmatpush.msra.mxu0 %v1054_v35 }
  0x11   :  { %319 = vmatpush.msra.mxu0 %v1059_v36 }
  0x13   :  { %825 = vmatmul.msk.f32.gmra.mxu2 %vm44_vm1, %v1000_v6  ;;  %320 = vmatpush.msra.mxu0 %v1065_v37 }
  0x15   :  { %321 = vmatpush.msra.mxu0 %v1071_v38 }
  0x1b   :  { %826 = vmatmul.msk.f32.gmra.mxu2 %vm44_vm1, %v1007_v7 }
  0x23   :  { %827 = vmatmul.msk.f32.gmra.mxu2 %vm44_vm1, %v1014_v8 }
  0x2b   :  { %828 = vmatmul.msk.f32.gmra.mxu2 %vm44_vm1, %v1021_v9 }
  0x33   :  { %829 = vmatmul.msk.f32.gmra.mxu2 %vm44_vm1, %v1028_v10 }
  0x3b   :  { %830 = vmatmul.msk.f32.gmra.mxu2 %vm44_vm1, %v1035_v11 }
  0x82   :  { %v70_v14 = vpop.f32.mrf.mxu0 }
  0x83   :  { %v1045_v15 = vadd.f32 %v70_v14, %v36_v13 }
  0x86   :  { %v140_v16 = vpop.f32.mrf.mxu2 }
  0x87   :  { %v141_v17 = vadd.f32 %v140_v16, %v1045_v15 }
  0x89   :  { %863 = vtanh.f32 %v141_v17  ;;  %v840_v19 = vmul.f32 -1.442695, %v141_v17 }
  0x8b   :  { %865 = vpow2.f32 %v840_v19 }
  0x8e   :  { %v143_v42 = vpop.f32.mrf.mxu2 }
  0x8f   :  { %v864_v18 = vpop.eup %863  ;;  %v144_v43 = vadd.f32 %v143_v42, %v1045_v15 }
  0x90   :  { %223 = vrot.lane.b32.xlu0 %v864_v18, %s935_s0 }
  0x91   :  { %v866_v20 = vpop.eup %865 }
  0x92   :  { %v205_v21 = vadd.f32 1.0, %v866_v20 }
  0x94   :  { %867 = vrcp.f32 %v205_v21  ;;  %v217_v27 = vand.u32 2147483648, %v205_v21  ;;  %vm211_vm3 = vweird.f32 %v205_v21  ;;  %v215_v28 = vand.u32 2147483647, %v205_v21 }
  0x96   :  { %v218_v30 = vor.u32 1.1754944e-38, %v217_v27  ;;  %vm216_vm5 = vcmp.eq.f32.partialorder %v215_v28, 8.507059e+37  ;;  %v146_v17 = vpop.f32.mrf.mxu2 }
  0x97   :  { %v147_v18 = vadd.f32 %v146_v17, %v1045_v15 }
  0x9a   :  { %v868_v22 = vpop.eup %867 }
  0x9b   :  { %v207_v23 = vmul.f32 %v868_v22, %v205_v21  ;;  %vm212_vm2 = vweird.f32 %v868_v22 }
  0x9c   :  { %vm213_vm4 = vmor %vm211_vm3, %vm212_vm2 }
  0x9d   :  { %v208_v24 = vsub.f32 1.0, %v207_v23 }
  0x9f   :  { %v209_v25 = vmul.f32 %v868_v22, %v208_v24 }
  0xa1   :  { %v210_v26 = vadd.f32 %v868_v22, %v209_v25 }
  0xa3   :  { %v214_v29 = vsel %vm213_vm4, %v868_v22, %v210_v26 }
  0xa4   :  { %v219_v32 = vsel %vm216_vm5, %v218_v30, %v214_v29 }
 0x102   :  { %v224_v31 = vpop.permute.xlu0 %223 }
 0x103   :  { %v226_v33 = vmul.f32 %v224_v31, %v219_v32 }
 0x105   :  { %869 = vtanh.f32 %v226_v33  ;;  %281 = vrot.lane.b32.xlu2 %v226_v33, %s936_s16 }
 0x10b   :  { %v870_v34 = vpop.eup %869 }
 0x10c   :  { %229 = vrot.lane.b32.xlu0 %v870_v34, %s937_s17 }
 0x15f   :  { %v282_v62 = vpop.permute.xlu2 %281 }
 0x17e   :  { %v230_v39 = vpop.permute.xlu0 %229 }
 0x17f   :  { %v232_v40 = vmul.f32 %v230_v39, %v219_v32 }
 0x181   :  { %234 = vrot.lane.b32.xlu1 %v232_v40, %s936_s16 }
 0x1f3   :  { %v235_v41 = vpop.permute.xlu1 %234 }
 0x1f4   :  { %841 = vmatmul.msk.f32.vlgmr.msrb.gmra.mxu0 %vm236_vm6, %v235_v41 }
 0x1f5   :  { %381 = vmatpush.msrb.mxu0 %v1054_v35 }
 0x1f7   :  { %382 = vmatpush.msrb.mxu0 %v1059_v36 }
 0x1f9   :  { %383 = vmatpush.msrb.mxu0 %v1065_v37 }
 0x1fb   :  { %384 = vmatpush.msrb.mxu0 %v1071_v38 }
 0x271   :  { %v256_v44 = vpop.f32.mrf.mxu0 }
 0x272   :  { %v259_v45 = vadd.f32 %v256_v44, %v144_v43 }
 0x274   :  { %871 = vtanh.f32 %v259_v45  ;;  %v842_v47 = vmul.f32 -1.442695, %v259_v45 }
 0x276   :  { %873 = vpow2.f32 %v842_v47 }
 0x27a   :  { %v872_v46 = vpop.eup %871 }
 0x27b   :  { %286 = vrot.lane.b32.xlu1 %v872_v46, %s935_s0 }
 0x27c   :  { %v874_v48 = vpop.eup %873 }
 0x27d   :  { %v263_v49 = vadd.f32 1.0, %v874_v48  ;;  %v149_v48 = vpop.f32.mrf.mxu2 }
 0x27f   :  { %875 = vrcp.f32 %v263_v49  ;;  %v275_v55 = vand.u32 2147483648, %v263_v49  ;;  %vm269_vm8 = vweird.f32 %v263_v49  ;;  %v273_v56 = vand.u32 2147483647, %v263_v49 }
 0x281   :  { %v276_v58 = vor.u32 1.1754944e-38, %v275_v55  ;;  %vm274_vm10 = vcmp.eq.f32.partialorder %v273_v56, 8.507059e+37 }
 0x285   :  { %v876_v50 = vpop.eup %875 }
 0x286   :  { %v265_v51 = vmul.f32 %v876_v50, %v263_v49  ;;  %vm270_vm7 = vweird.f32 %v876_v50  ;;  %v150_v49 = vadd.f32 %v149_v48, %v1045_v15 }
 0x287   :  { %vm271_vm9 = vmor %vm269_vm8, %vm270_vm7 }
 0x288   :  { %v266_v52 = vsub.f32 1.0, %v265_v51 }
 0x28a   :  { %v267_v53 = vmul.f32 %v876_v50, %v266_v52 }
 0x28c   :  { %v268_v54 = vadd.f32 %v876_v50, %v267_v53 }
 0x28e   :  { %v272_v57 = vsel %vm271_vm9, %v876_v50, %v268_v54 }
 0x28f   :  { %v277_v60 = vsel %vm274_vm10, %v276_v58, %v272_v57 }
 0x290   :  { %v284_v63 = vmul.f32 %v282_v62, %v277_v60 }
 0x2ed   :  { %v287_v59 = vpop.permute.xlu1 %286 }
 0x2ee   :  { %v289_v61 = vmul.f32 %v287_v59, %v277_v60 }
 0x2f0   :  { %291 = vrot.lane.b32.xlu2 %v289_v61, %s936_s16 }
 0x34a   :  { %v292_v0 = vpop.permute.xlu2 %291 }
 0x34b   :  { %v294_v2 = vadd.f32 %v292_v0, %v284_v63 }
 0x34d   :  { %877 = vtanh.f32 %v294_v2 }
 0x353   :  { %v878_v3 = vpop.eup %877 }
 0x354   :  { %297 = vrot.lane.b32.xlu0 %v878_v3, %s935_s0 }
 0x3c6   :  { %v298_v13 = vpop.permute.xlu0 %297 }
 0x3c7   :  { %v300_v14 = vmul.f32 %v298_v13, %v277_v60 }
 0x3c9   :  { %302 = vrot.lane.b32.xlu1 %v300_v14, %s936_s16 }
 0x43b   :  { %v303_v16 = vpop.permute.xlu1 %302 }
 0x43c   :  { %843 = vmatmul.msk.f32.vlgmr.msra.gmra.mxu0 %vm236_vm6, %v303_v16 }
 0x43d   :  { %507 = vmatpush.msra.mxu0 %v1054_v35 }
 0x43f   :  { %508 = vmatpush.msra.mxu0 %v1059_v36 }
 0x441   :  { %509 = vmatpush.msra.mxu0 %v1065_v37 }
 0x443   :  { %510 = vmatpush.msra.mxu0 %v1071_v38 }
 0x4b9   :  { %v323_v19 = vpop.f32.mrf.mxu0 }
 0x4ba   :  { %v326_v20 = vadd.f32 %v323_v19, %v147_v18  ;;  %v29_v19 = vld [vmem:[%s1269_s2 + $0x8] sm:$0xf] }
 0x4bb   :  { %831 = vmatpush.msk.msra.mxu3 %vm48_vm0, %v29_v19 }
 0x4bc   :  { %879 = vtanh.f32 %v326_v20  ;;  %v844_v22 = vmul.f32 -1.442695, %v326_v20  ;;  %832 = vmatmul.msk.f32.vlgmr.msra.gmra.mxu3 %vm44_vm1, %v974_v1  ;;  %v31_v20 = vld [vmem:[%s1269_s2 + $0x8] sm:$0xf0] }
 0x4be   :  { %881 = vpow2.f32 %v844_v22 }
 0x4c2   :  { %v880_v21 = vpop.eup %879 }
 0x4c3   :  { %349 = vrot.lane.b32.xlu2 %v880_v21, %s935_s0  ;;  %v43_v21 = vrot.slane %v31_v20, 4 }
 0x4c4   :  { %v882_v23 = vpop.eup %881  ;;  %833 = vmatmul.msk.f32.gmra.mxu3 %vm44_vm1, %v993_v5 }
 0x4c5   :  { %v330_v24 = vadd.f32 1.0, %v882_v23  ;;  %820 = vmatpush.msk.msra.mxu1 %vm48_vm0, %v43_v21 }
 0x4c6   :  { %821 = vmatmul.msk.f32.vlgmr.msra.gmra.mxu1 %vm44_vm1, %v983_v4 }
 0x4c7   :  { %883 = vrcp.f32 %v330_v24  ;;  %v342_v30 = vand.u32 2147483648, %v330_v24  ;;  %vm336_vm12 = vweird.f32 %v330_v24  ;;  %v340_v31 = vand.u32 2147483647, %v330_v24  ;;  %444 = vmatpush.msrb.mxu1 %v1054_v35 }
 0x4c9   :  { %v343_v33 = vor.u32 1.1754944e-38, %v342_v30  ;;  %vm341_vm14 = vcmp.eq.f32.partialorder %v340_v31, 8.507059e+37  ;;  %445 = vmatpush.msrb.mxu1 %v1059_v36 }
 0x4cb   :  { %446 = vmatpush.msrb.mxu1 %v1065_v37 }
 0x4cc   :  { %834 = vmatmul.msk.f32.gmra.mxu3 %vm44_vm1, %v1000_v6 }
 0x4cd   :  { %v884_v25 = vpop.eup %883  ;;  %447 = vmatpush.msrb.mxu1 %v1071_v38 }
 0x4ce   :  { %v332_v26 = vmul.f32 %v884_v25, %v330_v24  ;;  %vm337_vm11 = vweird.f32 %v884_v25 }
 0x4cf   :  { %vm338_vm13 = vmor %vm336_vm12, %vm337_vm11  ;;  %570 = vmatpush.msra.mxu1 %v1054_v35 }
 0x4d0   :  { %v333_v27 = vsub.f32 1.0, %v332_v26 }
 0x4d1   :  { %571 = vmatpush.msra.mxu1 %v1059_v36 }
 0x4d2   :  { %v334_v28 = vmul.f32 %v884_v25, %v333_v27 }
 0x4d3   :  { %572 = vmatpush.msra.mxu1 %v1065_v37 }
 0x4d4   :  { %v335_v29 = vadd.f32 %v884_v25, %v334_v28  ;;  %835 = vmatmul.msk.f32.gmra.mxu3 %vm44_vm1, %v1007_v7 }
 0x4d5   :  { %573 = vmatpush.msra.mxu1 %v1071_v38 }
 0x4d6   :  { %v339_v32 = vsel %vm338_vm13, %v884_v25, %v335_v29 }
 0x4d7   :  { %v344_v39 = vsel %vm341_vm14, %v343_v33, %v339_v32 }
 0x4d8   :  { %v347_v41 = vmul.f32 %v344_v39, %v294_v2 }
 0x4dc   :  { %836 = vmatmul.msk.f32.gmra.mxu3 %vm44_vm1, %v1014_v8 }
 0x4e4   :  { %837 = vmatmul.msk.f32.gmra.mxu3 %vm44_vm1, %v1021_v9 }
 0x4ec   :  { %838 = vmatmul.msk.f32.gmra.mxu3 %vm44_vm1, %v1028_v10 }
 0x4f4   :  { %839 = vmatmul.msk.f32.gmra.mxu3 %vm44_vm1, %v1035_v11 }
 0x51d   :  { %v350_v34 = vpop.permute.xlu2 %349 }
 0x51e   :  { %v352_v40 = vmul.f32 %v350_v34, %v344_v39 }
 0x520   :  { %354 = vrot.lane.b32.xlu0 %v352_v40, %s936_s16 }
 0x53f   :  { %v181_v1 = vpop.f32.mrf.mxu3 }
 0x547   :  { %v183_v4 = vpop.f32.mrf.mxu3 }
 0x54f   :  { %v185_v6 = vpop.f32.mrf.mxu3 }
 0x557   :  { %v187_v7 = vpop.f32.mrf.mxu3 }
 0x55f   :  { %v189_v8 = vpop.f32.mrf.mxu3 }
 0x592   :  { %v355_v42 = vpop.permute.xlu0 %354 }
 0x593   :  { %v357_v43 = vadd.f32 %v355_v42, %v347_v41 }
 0x595   :  { %885 = vtanh.f32 %v357_v43 }
 0x59b   :  { %v886_v44 = vpop.eup %885 }
 0x59c   :  { %360 = vrot.lane.b32.xlu1 %v886_v44, %s935_s0 }
 0x60e   :  { %v361_v45 = vpop.permute.xlu1 %360 }
 0x60f   :  { %v363_v46 = vmul.f32 %v361_v45, %v344_v39 }
 0x611   :  { %365 = vrot.lane.b32.xlu2 %v363_v46, %s936_s16 }
 0x66b   :  { %v366_v47 = vpop.permute.xlu2 %365 }
 0x66c   :  { %845 = vmatmul.msk.f32.vlgmr.msrb.gmra.mxu0 %vm236_vm6, %v366_v47 }
 0x66d   :  { %633 = vmatpush.msrb.mxu0 %v1054_v35  ;;  %v191_v35 = vpop.f32.mrf.mxu3 }
 0x66f   :  { %634 = vmatpush.msrb.mxu0 %v1059_v36  ;;  %v1148_v36 = vpop.f32.mrf.mxu1 }
 0x671   :  { %635 = vmatpush.msrb.mxu0 %v1065_v37  ;;  %v152_v37 = vpop.f32.mrf.mxu2 }
 0x673   :  { %636 = vmatpush.msrb.mxu0 %v1071_v38  ;;  %v153_v38 = vadd.f32 %v152_v37, %v1045_v15 }
 0x675   :  { %v193_v9 = vpop.f32.mrf.mxu3 }
 0x6e9   :  { %v386_v50 = vpop.f32.mrf.mxu0 }
 0x6ea   :  { %v389_v51 = vadd.f32 %v386_v50, %v150_v49 }
 0x6ec   :  { %887 = vtanh.f32 %v389_v51  ;;  %v846_v53 = vmul.f32 -1.442695, %v389_v51  ;;  %v155_v51 = vpop.f32.mrf.mxu2 }
 0x6ee   :  { %889 = vpow2.f32 %v846_v53 }
 0x6f2   :  { %v888_v52 = vpop.eup %887 }
 0x6f3   :  { %412 = vrot.lane.b32.xlu0 %v888_v52, %s935_s0  ;;  %v156_v52 = vadd.f32 %v155_v51, %v1045_v15 }
 0x6f4   :  { %v890_v54 = vpop.eup %889  ;;  %v158_v4 = vpop.f32.mrf.mxu2 }
 0x6f5   :  { %v393_v55 = vadd.f32 1.0, %v890_v54 }
 0x6f7   :  { %891 = vrcp.f32 %v393_v55  ;;  %v405_v61 = vand.u32 2147483648, %v393_v55  ;;  %vm399_vm2 = vweird.f32 %v393_v55  ;;  %v403_v62 = vand.u32 2147483647, %v393_v55 }
 0x6f9   :  { %v406_v0 = vor.u32 1.1754944e-38, %v405_v61  ;;  %vm404_vm4 = vcmp.eq.f32.partialorder %v403_v62, 8.507059e+37 }
 0x6fd   :  { %v892_v56 = vpop.eup %891 }
 0x6fe   :  { %v395_v57 = vmul.f32 %v892_v56, %v393_v55  ;;  %vm400_vm15 = vweird.f32 %v892_v56 }
 0x6ff   :  { %vm401_vm3 = vmor %vm399_vm2, %vm400_vm15 }
 0x700   :  { %v396_v58 = vsub.f32 1.0, %v395_v57 }
 0x702   :  { %v397_v59 = vmul.f32 %v892_v56, %v396_v58 }
 0x704   :  { %v398_v60 = vadd.f32 %v892_v56, %v397_v59 }
 0x706   :  { %v402_v63 = vsel %vm401_vm3, %v892_v56, %v398_v60 }
 0x707   :  { %v407_v3 = vsel %vm404_vm4, %v406_v0, %v402_v63 }
 0x708   :  { %v410_v14 = vmul.f32 %v407_v3, %v357_v43 }
 0x765   :  { %v413_v2 = vpop.permute.xlu0 %412 }
 0x766   :  { %v415_v13 = vmul.f32 %v413_v2, %v407_v3 }
 0x768   :  { %417 = vrot.lane.b32.xlu1 %v415_v13, %s936_s16 }
 0x7da   :  { %v418_v16 = vpop.permute.xlu1 %417 }
 0x7db   :  { %v1108_v17 = vadd.f32 %v418_v16, %v410_v14 }
 0x7dd   :  { %893 = vtanh.f32 %v1108_v17 }
 0x7e3   :  { %v894_v18 = vpop.eup %893 }
 0x7e4   :  { %423 = vrot.lane.b32.xlu2 %v894_v18, %s935_s0 }
 0x83e   :  { %v424_v22 = vpop.permute.xlu2 %423 }
 0x83f   :  { %v426_v23 = vmul.f32 %v424_v22, %v407_v3 }
 0x841   :  { %428 = vrot.lane.b32.xlu0 %v426_v23, %s936_s16 }
 0x8b3   :  { %v429_v5 = vpop.permute.xlu0 %428 }
 0x8b4   :  { %847 = vmatmul.msk.f32.vlgmr.msrb.gmra.mxu1 %vm236_vm6, %v429_v5  ;;  %v159_v5 = vadd.f32 %v158_v4, %v1045_v15 }
 0x931   :  { %v449_v24 = vpop.f32.mrf.mxu1 }
 0x932   :  { %v452_v10 = vadd.f32 %v449_v24, %v153_v38 }
 0x934   :  { %895 = vtanh.f32 %v452_v10  ;;  %v848_v11 = vmul.f32 -1.442695, %v452_v10 }
 0x936   :  { %897 = vpow2.f32 %v848_v11 }
 0x93a   :  { %v896_v25 = vpop.eup %895 }
 0x93b   :  { %475 = vrot.lane.b32.xlu1 %v896_v25, %s935_s0 }
 0x93c   :  { %v898_v26 = vpop.eup %897 }
 0x93d   :  { %v456_v27 = vadd.f32 1.0, %v898_v26 }
 0x93f   :  { %899 = vrcp.f32 %v456_v27  ;;  %v468_v33 = vand.u32 2147483648, %v456_v27  ;;  %vm462_vm1 = vweird.f32 %v456_v27  ;;  %v466_v34 = vand.u32 2147483647, %v456_v27 }
 0x941   :  { %v469_v40 = vor.u32 1.1754944e-38, %v468_v33  ;;  %vm467_vm7 = vcmp.eq.f32.partialorder %v466_v34, 8.507059e+37 }
 0x945   :  { %v900_v28 = vpop.eup %899 }
 0x946   :  { %v458_v29 = vmul.f32 %v900_v28, %v456_v27  ;;  %vm463_vm0 = vweird.f32 %v900_v28 }
 0x947   :  { %vm464_vm5 = vmor %vm462_vm1, %vm463_vm0 }
 0x948   :  { %v459_v30 = vsub.f32 1.0, %v458_v29 }
 0x94a   :  { %v460_v31 = vmul.f32 %v900_v28, %v459_v30 }
 0x94c   :  { %v461_v32 = vadd.f32 %v900_v28, %v460_v31 }
 0x94e   :  { %v465_v39 = vsel %vm464_vm5, %v900_v28, %v461_v32 }
 0x94f   :  { %v470_v42 = vsel %vm467_vm7, %v469_v40, %v465_v39 }
 0x950   :  { %v473_v44 = vmul.f32 %v470_v42, %v1108_v17 }
 0x9ad   :  { %v476_v41 = vpop.permute.xlu1 %475 }
 0x9ae   :  { %v478_v43 = vmul.f32 %v476_v41, %v470_v42  ;;  %v37_v41 = vperm.slane %v1042_v12, 1 }
 0x9b0   :  { %480 = vrot.lane.b32.xlu2 %v478_v43, %s936_s16  ;;  %v195_v43 = vpop.f32.mrf.mxu3 }
 0xa0a   :  { %v481_v45 = vpop.permute.xlu2 %480 }
 0xa0b   :  { %v483_v46 = vadd.f32 %v481_v45, %v473_v44 }
 0xa0d   :  { %901 = vtanh.f32 %v483_v46 }
 0xa13   :  { %v902_v47 = vpop.eup %901 }
 0xa14   :  { %486 = vrot.lane.b32.xlu0 %v902_v47, %s935_s0 }
 0xa86   :  { %v487_v48 = vpop.permute.xlu0 %486 }
 0xa87   :  { %v489_v49 = vmul.f32 %v487_v48, %v470_v42  ;;  %v91_v42 = vadd.f32 %v1148_v36, %v37_v41  ;;  %v730_v41 = vld [vmem:[%s1272_s3 + $0xc0] sm:$0xff] }
 0xa89   :  { %491 = vrot.lane.b32.xlu1 %v489_v49, %s936_s16  ;;  %v161_v49 = vpop.f32.mrf.mxu2 }
 0xafb   :  { %v492_v50 = vpop.permute.xlu1 %491 }
 0xafc   :  { %849 = vmatmul.msk.f32.vlgmr.msra.gmra.mxu0 %vm236_vm6, %v492_v50  ;;  %v162_v50 = vadd.f32 %v161_v49, %v1045_v15  ;;  %v722_v49 = vld [vmem:[%s1272_s3 + $0x80] sm:$0xff] }
 0xb79   :  { %v512_v53 = vpop.f32.mrf.mxu0 }
 0xb7a   :  { %v515_v54 = vadd.f32 %v512_v53, %v156_v52 }
 0xb7c   :  { %903 = vtanh.f32 %v515_v54  ;;  %v850_v56 = vmul.f32 -1.442695, %v515_v54 }
 0xb7e   :  { %905 = vpow2.f32 %v850_v56 }
 0xb82   :  { %v904_v55 = vpop.eup %903 }
 0xb83   :  { %538 = vrot.lane.b32.xlu2 %v904_v55, %s935_s0 }
 0xb84   :  { %v906_v57 = vpop.eup %905 }
 0xb85   :  { %v519_v58 = vadd.f32 1.0, %v906_v57 }
 0xb87   :  { %907 = vrcp.f32 %v519_v58  ;;  %v531_v0 = vand.u32 2147483648, %v519_v58  ;;  %vm525_vm9 = vweird.f32 %v519_v58  ;;  %v529_v2 = vand.u32 2147483647, %v519_v58 }
 0xb89   :  { %v532_v13 = vor.u32 1.1754944e-38, %v531_v0  ;;  %vm530_vm11 = vcmp.eq.f32.partialorder %v529_v2, 8.507059e+37 }
 0xb8d   :  { %v908_v59 = vpop.eup %907 }
 0xb8e   :  { %v521_v60 = vmul.f32 %v908_v59, %v519_v58  ;;  %vm526_vm8 = vweird.f32 %v908_v59 }
 0xb8f   :  { %vm527_vm10 = vmor %vm525_vm9, %vm526_vm8 }
 0xb90   :  { %v522_v61 = vsub.f32 1.0, %v521_v60 }
 0xb92   :  { %v523_v62 = vmul.f32 %v908_v59, %v522_v61 }
 0xb94   :  { %v524_v63 = vadd.f32 %v908_v59, %v523_v62 }
 0xb96   :  { %v528_v3 = vsel %vm527_vm10, %v908_v59, %v524_v63 }
 0xb97   :  { %v533_v16 = vsel %vm530_vm11, %v532_v13, %v528_v3 }
 0xb98   :  { %v536_v18 = vmul.f32 %v533_v16, %v483_v46  ;;  %v196_v46 = vadd.f32 %v195_v43, %v91_v42  ;;  %v729_v42 = vld [vmem:[%s1272_s3 + $0xb8] sm:$0xff]  ;;  %v728_v43 = vld [vmem:[%s1272_s3 + $0xb0] sm:$0xff] }
 0xb9a   :  { %v855_v52 = vmul.f32 -1.442695, %v196_v46 }
 0xbdd   :  { %v539_v14 = vpop.permute.xlu2 %538 }
 0xbde   :  { %v541_v17 = vmul.f32 %v539_v14, %v533_v16 }
 0xbe0   :  { %543 = vrot.lane.b32.xlu0 %v541_v17, %s936_s16 }
 0xc52   :  { %v544_v19 = vpop.permute.xlu0 %543 }
 0xc53   :  { %v546_v20 = vadd.f32 %v544_v19, %v536_v18 }
 0xc55   :  { %909 = vtanh.f32 %v546_v20 }
 0xc5b   :  { %v910_v21 = vpop.eup %909 }
 0xc5c   :  { %549 = vrot.lane.b32.xlu1 %v910_v21, %s935_s0 }
 0xcce   :  { %v550_v22 = vpop.permute.xlu1 %549 }
 0xccf   :  { %v552_v23 = vmul.f32 %v550_v22, %v533_v16 }
 0xcd1   :  { %554 = vrot.lane.b32.xlu2 %v552_v23, %s936_s16 }
 0xd2b   :  { %v555_v1 = vpop.permute.xlu2 %554 }
 0xd2c   :  { %851 = vmatmul.msk.f32.vlgmr.msra.gmra.mxu1 %vm236_vm6, %v555_v1 }
 0xda9   :  { %v575_v6 = vpop.f32.mrf.mxu1 }
 0xdaa   :  { %v578_v7 = vadd.f32 %v575_v6, %v159_v5 }
 0xdac   :  { %911 = vtanh.f32 %v578_v7  ;;  %v852_v35 = vmul.f32 -1.442695, %v578_v7 }
 0xdae   :  { %913 = vpow2.f32 %v852_v35  ;;  %v716_v35 = vld [vmem:[%s1272_s3 + $0x50] sm:$0xff] }
 0xdb2   :  { %v912_v8 = vpop.eup %911 }
 0xdb3   :  { %601 = vrot.lane.b32.xlu0 %v912_v8, %s935_s0  ;;  %v717_v8 = vld [vmem:[%s1272_s3 + $0x58] sm:$0xff] }
 0xdb4   :  { %v914_v9 = vpop.eup %913  ;;  %753 = vmatpush.msrb.mxu1 %v717_v8 }
 0xdb5   :  { %v582_v37 = vadd.f32 1.0, %v914_v9  ;;  %v715_v9 = vld [vmem:[%s1272_s3 + $0x48] sm:$0xff] }
 0xdb6   :  { %754 = vmatpush.msrb.mxu1 %v716_v35 }
 0xdb7   :  { %915 = vrcp.f32 %v582_v37  ;;  %v594_v26 = vand.u32 2147483648, %v582_v37  ;;  %vm588_vm13 = vweird.f32 %v582_v37  ;;  %v592_v27 = vand.u32 2147483647, %v582_v37 }
 0xdb8   :  { %755 = vmatpush.msrb.mxu1 %v715_v9 }
 0xdb9   :  { %v595_v29 = vor.u32 1.1754944e-38, %v594_v26  ;;  %vm593_vm15 = vcmp.eq.f32.partialorder %v592_v27, 8.507059e+37  ;;  %v714_v26 = vld [vmem:[%s1272_s3 + $0x40] sm:$0xff]  ;;  %v713_v27 = vld [vmem:[%s1272_s3 + $0x38] sm:$0xff] }
 0xdba   :  { %756 = vmatpush.msrb.mxu1 %v714_v26  ;;  %778 = vmatpush.msra.mxu0 %v713_v27 }
 0xdbd   :  { %v916_v38 = vpop.eup %915 }
 0xdbe   :  { %v584_v24 = vmul.f32 %v916_v38, %v582_v37  ;;  %vm589_vm12 = vweird.f32 %v916_v38 }
 0xdbf   :  { %vm590_vm14 = vmor %vm588_vm13, %vm589_vm12 }
 0xdc0   :  { %v585_v10 = vsub.f32 1.0, %v584_v24 }
 0xdc2   :  { %v586_v25 = vmul.f32 %v916_v38, %v585_v10 }
 0xdc4   :  { %v587_v11 = vadd.f32 %v916_v38, %v586_v25 }
 0xdc6   :  { %v591_v28 = vsel %vm590_vm14, %v916_v38, %v587_v11 }
 0xdc7   :  { %v596_v31 = vsel %vm593_vm15, %v595_v29, %v591_v28  ;;  %v712_v28 = vld [vmem:[%s1272_s3 + $0x30] sm:$0xff]  ;;  %v711_v29 = vld [vmem:[%s1272_s3 + $0x28] sm:$0xff] }
 0xdc8   :  { %v599_v33 = vmul.f32 %v596_v31, %v546_v20  ;;  %779 = vmatpush.msra.mxu0 %v712_v28 }
 0xdca   :  { %780 = vmatpush.msra.mxu0 %v711_v29 }
 0xe25   :  { %v602_v30 = vpop.permute.xlu0 %601 }
 0xe26   :  { %v604_v32 = vmul.f32 %v602_v30, %v596_v31  ;;  %v710_v30 = vld [vmem:[%s1272_s3 + $0x20] sm:$0xff] }
 0xe27   :  { %781 = vmatpush.msra.mxu0 %v710_v30 }
 0xe28   :  { %606 = vrot.lane.b32.xlu1 %v604_v32, %s936_s16 }
 0xe9a   :  { %v607_v34 = vpop.permute.xlu1 %606 }
 0xe9b   :  { %v1166_v39 = vadd.f32 %v607_v34, %v599_v33  ;;  %v733_v34 = vld [vmem:[%s1272_s3 + $0xd8] sm:$0xff] }
 0xe9c   :  { %790 = vmatpush.msra.mxu1 %v733_v34 }
 0xe9d   :  { %917 = vtanh.f32 %v1166_v39 }
 0xe9e   :  { %919 = vtanh.f32 %v196_v46  ;;  %v725_v46 = vld [vmem:[%s1272_s3 + $0x98] sm:$0xff] }
 0xea3   :  { %v918_v40 = vpop.eup %917 }
 0xea4   :  { %612 = vrot.lane.b32.xlu2 %v918_v40, %s935_s0  ;;  %v920_v47 = vpop.eup %919  ;;  %v731_v40 = vld [vmem:[%s1272_s3 + $0xc8] sm:$0xff] }
 0xefe   :  { %v613_v44 = vpop.permute.xlu2 %612 }
 0xeff   :  { %v615_v45 = vmul.f32 %v613_v44, %v596_v31  ;;  %v727_v44 = vld [vmem:[%s1272_s3 + $0xa8] sm:$0xff] }
 0xf01   :  { %617 = vrot.lane.b32.xlu0 %v615_v45, %s936_s16  ;;  %v726_v45 = vld [vmem:[%s1272_s3 + $0xa0] sm:$0xff] }
 0xf09   :  { %700 = vrot.lane.b32.xlu0 %v920_v47, %s935_s0  ;;  %v724_v47 = vld [vmem:[%s1272_s3 + $0x90] sm:$0xff] }
 0xf73   :  { %v618_v48 = vpop.permute.xlu0 %617 }
 0xf74   :  { %853 = vmatmul.msk.f32.vlgmr.msrb.gmra.mxu0 %vm236_vm6, %v618_v48  ;;  %v723_v48 = vld [vmem:[%s1272_s3 + $0x88] sm:$0xff] }
 0xf7b   :  { %v701_v20 = vpop.permute.xlu0 %700 }
 0xff1   :  { %v638_v51 = vpop.f32.mrf.mxu0 }
 0xff2   :  { %v641_v12 = vadd.f32 %v638_v51, %v162_v50  ;;  %v721_v51 = vld [vmem:[%s1272_s3 + $0x78] sm:$0xff] }
 0xff4   :  { %921 = vtanh.f32 %v641_v12  ;;  %v854_v53 = vmul.f32 -1.442695, %v641_v12  ;;  %v720_v12 = vld [vmem:[%s1272_s3 + $0x70] sm:$0xff] }
 0xff5   :  { %923 = vpow2.f32 %v855_v52  ;;  %v718_v52 = vld [vmem:[%s1272_s3 + $0x60] sm:$0xff] }
 0xff6   :  { %925 = vpow2.f32 %v854_v53  ;;  %v861_v53 = vld [vmem:[%s1272_s3 + $0xe0] ss:$0 sm:$0xff] }
 0xffa   :  { %v922_v36 = vpop.eup %921 }
 0xffb   :  { %664 = vrot.lane.b32.xlu1 %v922_v36, %s935_s0  ;;  %v924_v54 = vpop.eup %923  ;;  %v719_v36 = vld [vmem:[%s1272_s3 + $0x68] sm:$0xff] }
 0xffc   :  { %v926_v55 = vpop.eup %925  ;;  %v682_v56 = vadd.f32 1.0, %v924_v54 }
 0xffd   :  { %v645_v57 = vadd.f32 1.0, %v926_v55 }
 0xffe   :  { %927 = vrcp.f32 %v682_v56  ;;  %vm688_vm2 = vweird.f32 %v682_v56  ;;  %v694_v2 = vand.u32 2147483648, %v682_v56  ;;  %v692_v13 = vand.u32 2147483647, %v682_v56 }
 0xfff   :  { %929 = vrcp.f32 %v645_v57  ;;  %v657_v16 = vand.u32 2147483648, %v645_v57  ;;  %vm651_vm1 = vweird.f32 %v645_v57  ;;  %v655_v18 = vand.u32 2147483647, %v645_v57 }
0x1000   :  { %v695_v17 = vor.u32 1.1754944e-38, %v694_v2  ;;  %vm693_vm5 = vcmp.eq.f32.partialorder %v692_v13, 8.507059e+37 }
0x1001   :  { %v658_v22 = vor.u32 1.1754944e-38, %v657_v16  ;;  %vm656_vm8 = vcmp.eq.f32.partialorder %v655_v18, 8.507059e+37 }
0x1004   :  { %v928_v58 = vpop.eup %927 }
0x1005   :  { %v930_v59 = vpop.eup %929  ;;  %v684_v60 = vmul.f32 %v928_v58, %v682_v56  ;;  %vm689_vm3 = vweird.f32 %v928_v58 }
0x1006   :  { %v647_v15 = vmul.f32 %v930_v59, %v645_v57  ;;  %vm690_vm4 = vmor %vm688_vm2, %vm689_vm3  ;;  %vm652_vm0 = vweird.f32 %v930_v59 }
0x1007   :  { %v685_v61 = vsub.f32 1.0, %v684_v60  ;;  %vm653_vm7 = vmor %vm651_vm1, %vm652_vm0 }
0x1008   :  { %v648_v62 = vsub.f32 1.0, %v647_v15  ;;  %v810_v15 = vld [vmem:[%s1273_s4] sm:$0xff] }
0x1009   :  { %v686_v63 = vmul.f32 %v928_v58, %v685_v61 }
0x100a   :  { %v649_v0 = vmul.f32 %v930_v59, %v648_v62 }
0x100b   :  { %v687_v3 = vadd.f32 %v928_v58, %v686_v63 }
0x100c   :  { %v650_v14 = vadd.f32 %v930_v59, %v649_v0 }
0x100d   :  { %v691_v19 = vsel %vm690_vm4, %v928_v58, %v687_v3 }
0x100e   :  { %v654_v21 = vsel %vm653_vm7, %v930_v59, %v650_v14  ;;  %v696_v23 = vsel %vm693_vm5, %v695_v17, %v691_v19  ;;  %v862_v59 = vld [vmem:[%s1272_s3 + $0xe8] ss:$0 sm:$0xff] }
0x100f   :  { %v703_v1 = vmul.f32 %v701_v20, %v696_v23  ;;  %v659_v5 = vsel %vm656_vm8, %v658_v22, %v654_v21 }
0x1010   :  { %v662_v37 = vmul.f32 %v659_v5, %v1166_v39  ;;  %v732_v39 = vld [vmem:[%s1272_s3 + $0xd0] sm:$0xff] }
0x1011   :  { %931 = vtanh.f32 %v703_v1  ;;  %791 = vmatpush.msra.mxu1 %v732_v39 }
0x1013   :  { %792 = vmatpush.msra.mxu1 %v731_v40 }
0x1015   :  { %793 = vmatpush.msra.mxu1 %v730_v41 }
0x1017   :  { %v932_v7 = vpop.eup %931  ;;  %794 = vmatpush.msra.mxu1 %v729_v42 }
0x1019   :  { %795 = vmatpush.msra.mxu1 %v728_v43 }
0x101b   :  { %796 = vmatpush.msra.mxu1 %v727_v44 }
0x101d   :  { %797 = vmatpush.msra.mxu1 %v726_v45 }
0x101f   :  { %798 = vmatpush.msra.mxu1 %v725_v46 }
0x1021   :  { %799 = vmatpush.msra.mxu1 %v724_v47 }
0x1023   :  { %800 = vmatpush.msra.mxu1 %v723_v48 }
0x1025   :  { %801 = vmatpush.msra.mxu1 %v722_v49 }
0x1027   :  { %802 = vmatpush.msra.mxu1 %v721_v51 }
0x1029   :  { %803 = vmatpush.msra.mxu1 %v720_v12 }
0x102b   :  { %804 = vmatpush.msra.mxu1 %v719_v36 }
0x102d   :  { %805 = vmatpush.msra.mxu1 %v718_v52 }
0x106d   :  { %v665_v4 = vpop.permute.xlu1 %664 }
0x106e   :  { %v667_v6 = vmul.f32 %v665_v4, %v659_v5 }
0x1070   :  { %669 = vrot.lane.b32.xlu2 %v667_v6, %s936_s16 }
0x1078   :  { %706 = vrot.lane.b32.xlu2 %v932_v7, %s937_s17 }
0x10ca   :  { %v670_v38 = vpop.permute.xlu2 %669 }
0x10cb   :  { %v672_v24 = vadd.f32 %v670_v38, %v662_v37 }
0x10cd   :  { %933 = vtanh.f32 %v672_v24 }
0x10d2   :  { %v707_v10 = vpop.permute.xlu2 %706 }
0x10d3   :  { %v934_v25 = vpop.eup %933  ;;  %v709_v11 = vmul.f32 %v707_v10, %v696_v23 }
0x10d4   :  { %675 = vrot.lane.b32.xlu1 %v934_v25, %s935_s0 }
0x10d5   :  { %737 = vrot.lane.b32.xlu0 %v709_v11, %s936_s16 }
0x1146   :  { %v676_v31 = vpop.permute.xlu1 %675 }
0x1147   :  { %v678_v32 = vmul.f32 %v676_v31, %v659_v5  ;;  %v738_v33 = vpop.permute.xlu0 %737 }
0x1148   :  { %856 = vmatmul.msk.f32.vlgmr.msrb.gmra.mxu1 %vm236_vm6, %v738_v33 }
0x1149   :  { %762 = vrot.lane.b32.xlu1 %v678_v32, %s936_s16 }
0x11bb   :  { %v763_v50 = vpop.permute.xlu1 %762 }
0x11bc   :  { %857 = vmatmul.msk.f32.vlgmr.msra.gmra.mxu0 %vm236_vm6, %v763_v50 }
0x11c5   :  { %v758_v54 = vpop.f32.mrf.mxu1 }
0x1239   :  { %v783_v55 = vpop.f32.mrf.mxu0 }
0x123a   :  { %v784_v56 = vadd.f32 %v783_v55, %v758_v54 }
0x123c   :  { %v787_v57 = vadd.f32 %v861_v53, %v784_v56 }
0x123e   :  { %v788_v58 = vmax.f32 %v787_v57, 0.0 }
0x1240   :  { %806 = vmatmul.f32.vlgmr.msra.gmra.mxu1 %v788_v58 }
0x12bd   :  { %v807_v60 = vpop.f32.mrf.mxu1 }
0x12be   :  { %v808_v61 = vadd.f32 %v862_v59, %v807_v60 }
0x12c0   :  { %v811_v62 = vmul.f32 %v810_v15, %v808_v61 }
0x12c2   :  { %812 = vst [vmem:[%s1274_s5] sm:$0xff] %v811_v62 }

</bundles_post_ra>
